<compile_context>
chip_gen: v5e
topology: v5e:2x2
jax: 0.10.0
libtpu: 0.0.40
codegen_flags: <defaults>
</compile_context>

<pallas_src>
import jax
import jax.numpy as jnp
import numpy as np
from jax.experimental import pallas as pl
from jax.experimental.pallas import tpu as pltpu

# ---------------- model config (small synthetic sizes) ----------------
VOCAB = 50
EMBED = 16
KERNEL_SIZES = (3, 4, 5)
NUM_CHANNELS = (8, 8, 16)          # sum = 32
BATCH = 4
SEQ = 16
CIN = 2 * EMBED                    # concat of embedding + constant_embedding
NUM_CLASSES = 2
FEAT = sum(NUM_CHANNELS)

K_MAX = max(KERNEL_SIZES)          # 5
K_MIN = min(KERNEL_SIZES)          # 3
T_UNI = SEQ - K_MIN + 1            # 14: unified number of conv positions
SEQ_PAD = T_UNI + K_MAX - 1        # 18: pad seq so every tap slice stays in range
TILE_B = 2                         # batch tile = parallel grid axis (re-derive for v7x VMEM at scale)
DEC_PAD = 128                      # lane-dense logits width (sliced to NUM_CLASSES outside)

# f32 keeps the strict check against the f32 reference.  On v6e/v7x flip to
# jnp.bfloat16 for a free DMA/vreg win (accumulation stays f32 via
# preferred_element_type); on v5e keep activations f32 (no bf16 VPU).
ACT_DTYPE = jnp.float32


# ------------- Pallas kernel: fused conv1d + relu + global-max-pool + linear -------------
def textcnn_kernel(emb_ref, conv_ref, dec_ref, out_ref):
    emb = emb_ref[...]                                   # (TILE_B, SEQ_PAD, CIN)

    # Accumulator initialised with the fused (bias | -1e30 validity-mask) term.
    acc = jnp.broadcast_to(
        conv_ref[K_MAX * CIN:, :].astype(jnp.float32)[None],   # (1, T_UNI, FEAT)
        (TILE_B, T_UNI, FEAT))

    # Fused conv: K_MAX accumulating MXU matmuls covering all kernel sizes /
    # output channels at once (zero-padded taps contribute exact zeros).
    for j in range(K_MAX):                               # static unroll over taps
        acc = acc + jax.lax.dot_general(
            emb[:, j:j + T_UNI, :],                      # (TILE_B, T_UNI, CIN)
            conv_ref[j * CIN:(j + 1) * CIN, :],          # (CIN, FEAT), 8-aligned slice
            dimension_numbers=(((2,), (0,)), ((), ())),
            preferred_element_type=jnp.float32)

    y = jnp.maximum(acc, 0.0)                            # ReLU; masked positions -> 0
    feat = jnp.max(y, axis=1)                            # GlobalMaxPool1d -> (TILE_B, FEAT)

    # TODO(synk): nn.Dropout(0.5) is train-time randomness; evaluated as identity here.
    logits = jnp.dot(feat, dec_ref[:FEAT, :].astype(jnp.float32),
                     preferred_element_type=jnp.float32)
    logits = logits + dec_ref[FEAT:, :].astype(jnp.float32)     # (TILE_B, DEC_PAD)
    out_ref[:, 0, :] = logits.astype(out_ref.dtype)


def textcnn_forward(tokens, params):
    emb_table, const_table, conv_ws, conv_bs, dec_w, dec_b = params

    # --- glue: embedding lookups + feature concat (plain JAX gather) ---
    e = jnp.take(emb_table, tokens, axis=0)              # (B, SEQ, E)
    ce = jnp.take(const_table, tokens, axis=0)           # (B, SEQ, E)
    emb = jnp.concatenate([e, ce], axis=-1)              # (B, SEQ, CIN)
    emb_pad = jnp.pad(emb, ((0, 0), (0, SEQ_PAD - SEQ), (0, 0)))    # (B, SEQ_PAD, CIN)

    # --- pack all conv parameters into one flat operand ---
    # fused weight: zero-pad taps to K_MAX, concat over Cout -> (K_MAX*CIN, FEAT)
    w_fused = jnp.concatenate(
        [jnp.pad(w, ((0, K_MAX - k), (0, 0), (0, 0)))
         for w, k in zip(conv_ws, KERNEL_SIZES)],
        axis=-1).reshape(K_MAX * CIN, FEAT)
    # fused bias + validity mask: bias where t < SEQ - k + 1, else -1e30
    limits = jnp.concatenate(
        [jnp.full((c,), SEQ - k + 1, jnp.int32)
         for c, k in zip(NUM_CHANNELS, KERNEL_SIZES)])                    # (FEAT,)
    b_fused = jnp.concatenate([b.reshape(-1) for b in conv_bs])           # (FEAT,)
    bias_mask = jnp.where(jnp.arange(T_UNI)[:, None] < limits[None, :],
                          b_fused[None, :], -1e30)                        # (T_UNI, FEAT)
    conv_pack = jnp.concatenate([w_fused, bias_mask], axis=0)             # (K_MAX*CIN+T_UNI, FEAT)

    # --- pack the decoder, lane-padded to DEC_PAD for a dense final store ---
    dec_pack = jnp.concatenate([dec_w, dec_b.reshape(1, NUM_CLASSES)], axis=0)  # (FEAT+1, 2)
    dec_pack = jnp.pad(dec_pack, ((0, 0), (0, DEC_PAD - NUM_CLASSES)))          # (FEAT+1, 128)

    assert BATCH % TILE_B == 0
    out = pl.pallas_call(
        textcnn_kernel,
        out_shape=jax.ShapeDtypeStruct((BATCH, 1, DEC_PAD), jnp.float32),
        grid=(BATCH // TILE_B,),
        in_specs=[
            pl.BlockSpec((TILE_B, SEQ_PAD, CIN), lambda i: (i, 0, 0)),   # batch-tiled
            pl.BlockSpec(conv_pack.shape, lambda i: (0, 0)),             # replicated
            pl.BlockSpec(dec_pack.shape, lambda i: (0, 0)),              # replicated
        ],
        out_specs=pl.BlockSpec((TILE_B, 1, DEC_PAD), lambda i: (i, 0, 0)),
        compiler_params=pltpu.CompilerParams(
            dimension_semantics=("parallel",)),          # v7x: batch splits across TCs
    )(emb_pad.astype(ACT_DTYPE), conv_pack.astype(ACT_DTYPE), dec_pack.astype(jnp.float32))
    return out[:, 0, :NUM_CLASSES]


# ---------------- pure-JAX reference (PyTorch NCW semantics) ----------------
def ref_forward(tokens, params):
    emb_table, const_table, conv_ws, conv_bs, dec_w, dec_b = params
    e = jnp.take(emb_table, tokens, axis=0)
    ce = jnp.take(const_table, tokens, axis=0)
    emb = jnp.concatenate([e, ce], axis=-1)              # (B, L, 2E)
    x = jnp.transpose(emb, (0, 2, 1))                    # (B, Cin, L) == permute(0,2,1)
    feats = []
    for w, b in zip(conv_ws, conv_bs):
        wt = jnp.transpose(w, (2, 1, 0))                 # (Cout, Cin, k) PyTorch layout
        y = jax.lax.conv_general_dilated(
            x, wt, window_strides=(1,), padding='VALID',
            dimension_numbers=('NCH', 'OIH', 'NCH'))
        y = y + b.reshape(1, -1, 1)
        y = jnp.maximum(y, 0.0)
        feats.append(jnp.max(y, axis=2))                 # global max pool over time
    enc = jnp.concatenate(feats, axis=1)
    return enc @ dec_w + dec_b                           # decoder Linear(sum(nc), 2)


# ---------------- deterministic parameter init ----------------
def init_params(key):
    keys = jax.random.split(key, 4 + 2 * len(KERNEL_SIZES))
    emb_table = jax.random.normal(keys[0], (VOCAB, EMBED), jnp.float32) * 0.1
    const_table = jax.random.normal(keys[1], (VOCAB, EMBED), jnp.float32) * 0.1
    conv_ws, conv_bs = [], []
    for idx, (c, k) in enumerate(zip(NUM_CHANNELS, KERNEL_SIZES)):
        # stored as (k, Cin, Cout); PyTorch Conv1d weight is (Cout, Cin, k)
        conv_ws.append(jax.random.normal(keys[2 + 2 * idx], (k, CIN, c),
                                         jnp.float32) * 0.1)
        conv_bs.append(jax.random.normal(keys[3 + 2 * idx], (1, c),
                                         jnp.float32) * 0.1)
    dec_w = jax.random.normal(keys[-2], (FEAT, NUM_CLASSES), jnp.float32) * 0.1
    dec_b = jax.random.normal(keys[-1], (1, NUM_CLASSES), jnp.float32) * 0.1
    return emb_table, const_table, tuple(conv_ws), tuple(conv_bs), dec_w, dec_b


if __name__ == "__main__":
    key = jax.random.PRNGKey(0)
    k_tok, k_params = jax.random.split(key)
    tokens = jax.random.randint(k_tok, (BATCH, SEQ), 0, VOCAB, dtype=jnp.int32)
    params = init_params(k_params)

    out = jax.block_until_ready(textcnn_forward(tokens, params))
    ref = jax.block_until_ready(ref_forward(tokens, params))
    np.testing.assert_allclose(np.asarray(out), np.asarray(ref),
                               rtol=1e-4, atol=1e-5)
    assert out.shape == (BATCH, NUM_CLASSES)
    print("KERNEL_OK")
</pallas_src>

<mosaic_0001>
module attributes {stable_mosaic.version = 11 : i64} {
  func.func @textcnn_kernel(%arg0: i32, %arg1: memref<2x18x32xf32, #tpu.memory_space<vmem>>, %arg2: memref<174x32xf32, #tpu.memory_space<vmem>>, %arg3: memref<33x128xf32, #tpu.memory_space<vmem>>, %arg4: memref<2x1x128xf32, #tpu.memory_space<vmem>>) attributes {dimension_semantics = [#tpu.dimension_semantics<parallel>], iteration_bounds = array<i64: 2>, scalar_prefetch = 0 : i64, scratch_operands = 0 : i64, tpu.core_type = #tpu.core_type<tc>, window_params = [{transform_indices = @transform_0, window_bounds = array<i64: 2, 18, 32>}, {pipeline_mode = #tpu.pipeline_mode<synchronous>, transform_indices = @transform_1, window_bounds = array<i64: 174, 32>}, {pipeline_mode = #tpu.pipeline_mode<synchronous>, transform_indices = @transform_2, window_bounds = array<i64: 33, 128>}, {transform_indices = @transform_3, window_bounds = array<i64: 2, 1, 128>}]} {
    %c0 = arith.constant 0 : index
    %c0_0 = arith.constant 0 : index
    %c0_1 = arith.constant 0 : index
    %0 = vector.load %arg1[%c0, %c0_0, %c0_1] : memref<2x18x32xf32, #tpu.memory_space<vmem>>, vector<2x18x32xf32>
    %c160 = arith.constant 160 : index
    %c0_2 = arith.constant 0 : index
    %1 = vector.load %arg2[%c160, %c0_2] : memref<174x32xf32, #tpu.memory_space<vmem>>, vector<14x32xf32>
    %2 = vector.shape_cast %1 : vector<14x32xf32> to vector<1x14x32xf32>
    %3 = vector.shape_cast %2 : vector<1x14x32xf32> to vector<1x14x32xf32>
    %4 = vector.broadcast %3 : vector<1x14x32xf32> to vector<2x14x32xf32>
    %5 = vector.extract_strided_slice %0 {offsets = [0, 0, 0], sizes = [2, 14, 32], strides = [1, 1, 1]} : vector<2x18x32xf32> to vector<2x14x32xf32>
    %c0_3 = arith.constant 0 : index
    %c0_4 = arith.constant 0 : index
    %6 = vector.load %arg2[%c0_3, %c0_4] : memref<174x32xf32, #tpu.memory_space<vmem>>, vector<32x32xf32>
    %cst = arith.constant dense<0.000000e+00> : vector<2x14x32xf32>
    %7 = tpu.matmul %5, %6, %cst {dimension_numbers = #tpu.dot_dimension_numbers<[2], [0], [0, 1], [1], [0, 0, 0, 1, 1, 1], [], []>} : vector<2x14x32xf32>, vector<32x32xf32>, vector<2x14x32xf32> -> vector<2x14x32xf32>
    %8 = arith.addf %4, %7 : vector<2x14x32xf32>
    %9 = vector.extract_strided_slice %0 {offsets = [0, 1, 0], sizes = [2, 14, 32], strides = [1, 1, 1]} : vector<2x18x32xf32> to vector<2x14x32xf32>
    %c32 = arith.constant 32 : index
    %c0_5 = arith.constant 0 : index
    %10 = vector.load %arg2[%c32, %c0_5] : memref<174x32xf32, #tpu.memory_space<vmem>>, vector<32x32xf32>
    %cst_6 = arith.constant dense<0.000000e+00> : vector<2x14x32xf32>
    %11 = tpu.matmul %9, %10, %cst_6 {dimension_numbers = #tpu.dot_dimension_numbers<[2], [0], [0, 1], [1], [0, 0, 0, 1, 1, 1], [], []>} : vector<2x14x32xf32>, vector<32x32xf32>, vector<2x14x32xf32> -> vector<2x14x32xf32>
    %12 = arith.addf %8, %11 : vector<2x14x32xf32>
    %13 = vector.extract_strided_slice %0 {offsets = [0, 2, 0], sizes = [2, 14, 32], strides = [1, 1, 1]} : vector<2x18x32xf32> to vector<2x14x32xf32>
    %c64 = arith.constant 64 : index
    %c0_7 = arith.constant 0 : index
    %14 = vector.load %arg2[%c64, %c0_7] : memref<174x32xf32, #tpu.memory_space<vmem>>, vector<32x32xf32>
    %cst_8 = arith.constant dense<0.000000e+00> : vector<2x14x32xf32>
    %15 = tpu.matmul %13, %14, %cst_8 {dimension_numbers = #tpu.dot_dimension_numbers<[2], [0], [0, 1], [1], [0, 0, 0, 1, 1, 1], [], []>} : vector<2x14x32xf32>, vector<32x32xf32>, vector<2x14x32xf32> -> vector<2x14x32xf32>
    %16 = arith.addf %12, %15 : vector<2x14x32xf32>
    %17 = vector.extract_strided_slice %0 {offsets = [0, 3, 0], sizes = [2, 14, 32], strides = [1, 1, 1]} : vector<2x18x32xf32> to vector<2x14x32xf32>
    %c96 = arith.constant 96 : index
    %c0_9 = arith.constant 0 : index
    %18 = vector.load %arg2[%c96, %c0_9] : memref<174x32xf32, #tpu.memory_space<vmem>>, vector<32x32xf32>
    %cst_10 = arith.constant dense<0.000000e+00> : vector<2x14x32xf32>
    %19 = tpu.matmul %17, %18, %cst_10 {dimension_numbers = #tpu.dot_dimension_numbers<[2], [0], [0, 1], [1], [0, 0, 0, 1, 1, 1], [], []>} : vector<2x14x32xf32>, vector<32x32xf32>, vector<2x14x32xf32> -> vector<2x14x32xf32>
    %20 = arith.addf %16, %19 : vector<2x14x32xf32>
    %21 = vector.extract_strided_slice %0 {offsets = [0, 4, 0], sizes = [2, 14, 32], strides = [1, 1, 1]} : vector<2x18x32xf32> to vector<2x14x32xf32>
    %c128 = arith.constant 128 : index
    %c0_11 = arith.constant 0 : index
    %22 = vector.load %arg2[%c128, %c0_11] : memref<174x32xf32, #tpu.memory_space<vmem>>, vector<32x32xf32>
    %cst_12 = arith.constant dense<0.000000e+00> : vector<2x14x32xf32>
    %23 = tpu.matmul %21, %22, %cst_12 {dimension_numbers = #tpu.dot_dimension_numbers<[2], [0], [0, 1], [1], [0, 0, 0, 1, 1, 1], [], []>} : vector<2x14x32xf32>, vector<32x32xf32>, vector<2x14x32xf32> -> vector<2x14x32xf32>
    %24 = arith.addf %20, %23 : vector<2x14x32xf32>
    %cst_13 = arith.constant 0.000000e+00 : f32
    %25 = vector.broadcast %cst_13 : f32 to vector<2x14x32xf32>
    %26 = arith.maximumf %24, %25 : vector<2x14x32xf32>
    %cst_14 = arith.constant dense<0xFF800000> : vector<2x32xf32>
    %27 = vector.multi_reduction <maximumf>, %26, %cst_14 [1] : vector<2x14x32xf32> to vector<2x32xf32>
    %c0_15 = arith.constant 0 : index
    %c0_16 = arith.constant 0 : index
    %28 = vector.load %arg3[%c0_15, %c0_16] : memref<33x128xf32, #tpu.memory_space<vmem>>, vector<32x128xf32>
    %cst_17 = arith.constant dense<0.000000e+00> : vector<2x128xf32>
    %29 = tpu.matmul %27, %28, %cst_17 {dimension_numbers = #tpu.dot_dimension_numbers<[1], [0], [0], [1], [0, 0, 1, 1], [], []>} : vector<2x32xf32>, vector<32x128xf32>, vector<2x128xf32> -> vector<2x128xf32>
    %c32_18 = arith.constant 32 : index
    %c0_19 = arith.constant 0 : index
    %30 = vector.load %arg3[%c32_18, %c0_19] : memref<33x128xf32, #tpu.memory_space<vmem>>, vector<1x128xf32>
    %31 = vector.broadcast %30 : vector<1x128xf32> to vector<2x128xf32>
    %32 = arith.addf %29, %31 : vector<2x128xf32>
    %c0_20 = arith.constant 0 : index
    %c0_21 = arith.constant 0 : index
    %c0_22 = arith.constant 0 : index
    %33 = vector.load %arg4[%c0_20, %c0_21, %c0_22] : memref<2x1x128xf32, #tpu.memory_space<vmem>>, vector<2x1x128xf32>
    %34 = vector.shape_cast %33 : vector<2x1x128xf32> to vector<2x128xf32>
    %35 = vector.shape_cast %32 : vector<2x128xf32> to vector<2x1x128xf32>
    tpu.vector_store %arg4[%c0_20, %c0_21, %c0_22], %35 {strides = array<i32>} : memref<2x1x128xf32, #tpu.memory_space<vmem>>, vector<2x1x128xf32>,
    return
  }
  func.func @transform_0(%arg0: i32) -> (i32, i32, i32) {
    %c0_i32 = arith.constant 0 : i32
    %c0_i32_0 = arith.constant 0 : i32
    %c0_i32_1 = arith.constant 0 : i32
    return %arg0, %c0_i32, %c0_i32_0 : i32, i32, i32
  }
  func.func @transform_1(%arg0: i32) -> (i32, i32) {
    %c0_i32 = arith.constant 0 : i32
    %c0_i32_0 = arith.constant 0 : i32
    %c0_i32_1 = arith.constant 0 : i32
    return %c0_i32, %c0_i32_0 : i32, i32
  }
  func.func @transform_2(%arg0: i32) -> (i32, i32) {
    %c0_i32 = arith.constant 0 : i32
    %c0_i32_0 = arith.constant 0 : i32
    %c0_i32_1 = arith.constant 0 : i32
    return %c0_i32, %c0_i32_0 : i32, i32
  }
  func.func @transform_3(%arg0: i32) -> (i32, i32, i32) {
    %c0_i32 = arith.constant 0 : i32
    %c0_i32_0 = arith.constant 0 : i32
    %c0_i32_1 = arith.constant 0 : i32
    return %arg0, %c0_i32, %c0_i32_0 : i32, i32, i32
  }
}

</mosaic_0001>

<bundles_post_ra>
// kernel: tpu_custom_call.1
= control target key start
LH: loop header
LB: loop body
LE: loop exit
PB: predicated region body
PF: predicated region fallthrough
CT: control target
= control target key end

     0   :  { %8 = vsyncpa [#allocation3], 0  ;;  %s1644_s0 = inlined_call_operand.vmem [shape: f32[4,18,32], index: 0, kind: input, shape index: {}]   ;;  %s1645_s1 = inlined_call_operand.vmem [shape: f32[174,32], index: 1, kind: input, shape index: {}]   ;;  %s1646_s2 = inlined_call_operand.vmem [shape: f32[33,128], index: 2, kind: input, shape index: {}]   ;;  %s1647_s3 = inlined_call_operand.hbm [shape: f32[4,1,128], index: 3, kind: output, shape index: {}]  }
   0x1   :  { %10 = vsyncpa [#allocation3 + $0x1], 0  ;;  %s1250_s12 = smov 0   ;;  %s1252_s13 = smov 0  }
   0x2   :  { %s1254_s14 = smov 0   ;;  %s1256_s15 = smov 0  }
   0x3 LB: > { %s1074_s16 = sadd.s32 4294967295, %s1226_s15   ;;  %s1075_s17 = sadd.s32 4294967294, %s1226_s15   ;;  %s1226_s15 = sphi %s1256_s15, %s1655_s15   ;;  %s1222_s14 = sphi %s1254_s14, %s1654_s14   ;;  %s1218_s13 = sphi %s1252_s13, %s1653_s13   ;;  %s1214_s12 = sphi %s1250_s12, %s1652_s12  }
   0x4   : > { %s1273_s18 = sadd.s32 1, %s1226_s15   ;;  %s91_s19 = sadd.s32 1, %s1222_s14 }
   0x5   : > { %s88_s20 = ssub.s32 %s1226_s15, %s1273_s18  ;;  %p101_p0 = scmp.ne.s32.totalorder %s1222_s14, %s1218_s13 }
   0x6   : > { %p89_p1 = scmp.eq.s32.totalorder %s88_s20, 0  ;;  %p102_p2 = scmp.eq.s32.totalorder %s1074_s16, 1 }
   0x7   : > { %p107_p3 = scmp.ne.s32.totalorder %s1218_s13, %s1214_s12  ;;  %p108_p4 = scmp.eq.s32.totalorder %s1075_s17, 1 }
   0x8   : > { %s1283_s21 = scalar_select %p89_p1, %s1222_s14, %s91_s19  }
   0x9   : > { %p1285_p5 = por %p102_p2, %p101_p0  ;;  %p1289_p6 = por %p108_p4, %p107_p3 }
   0xa   : > { %p1078_p7 = scmp.ge.s32.totalorder %s1226_s15, 1  ;;  %p142_p8 = scmp.lt.s32.totalorder %s1226_s15, 3 }
   0xc   : > { %p143_p9 = pnand %p1078_p7, %p142_p8 }
   0xd   : > { %s1301_s28 = sshll.u32 (!%p143_p9), %s1074_s16, 1  ;;  %s164_s29 = sand.u32 (!%p143_p9), 1, %s1218_s13  }
   0xe   : > { %146 = sbr.rel (%p143_p9) target bundleno = 1093 (0x445), region = 32  ;;  %p168_p10 = scmp.lt.s32.totalorder (!%p143_p9), %s1301_s28, 3 }
   0xf   : > { %s1079_s30 = sshll.u32 (!%p143_p9), %s164_s29, 1  ;;  %s999_s16 = scalar_lea.sflag (!%p143_p9), [#allocation3], %s164_s29 }
  0x10   : > { %s166_s8 = scalar_lea.vmem (!%p143_p9), [#allocation2], %s1079_s30  ;;  %s1184_s24 = scalar_lea.hbm (!%p143_p9), %s1647_s3, 4 }
  0x11   : > { %s1010_s9 = sshll.u32 (!%p143_p9), %s166_s8, 4  ;;  %s1011_s9 = int_to_ptr.vmem [resolvable:$true] %s1010_s9 }
  0x13   : > { %v186_v0 = vld [vmem:[%s1645_s1 + $0x18] sm:$0xff]  ;;  %v185_v1 = vld [vmem:[%s1645_s1 + $0x10] sm:$0xff]  ;;  %v184_v2 = vld [vmem:[%s1645_s1 + $0x8] sm:$0xff]  ;;  %s169_s4 = scalar_select %p168_p10, %s1301_s28, 3  ;;  %vm226_vm0 = vcmask 261120   ;;  %vm316_vm1 = vcmask 1040384  }
  0x14   : > { %247 = vmatpush.msra.mxu0 %v186_v0  ;;  %1113 = vmatpush.msra.mxu2 %v186_v0  ;;  %v183_v3 = vld [vmem:[%s1645_s1] sm:$0xff]  ;;  %v313_v23 = vld [vmem:[%s1645_s1 + $0x38] sm:$0xff]  ;;  %v312_v27 = vld [vmem:[%s1645_s1 + $0x30] sm:$0xff]  ;;  %vm317_vm2 = vcmask 1042434   ;;  %vm319_vm4 = vcmask 1044484   ;;  %vm321_vm5 = vcmask 1046534  }
  0x15   : > { %1114 = vmatpush.msra.mxu3 %v186_v0  ;;  %s1121_s7 = smul.u32 24, %s169_s4  ;;  %412 = vmatpush.msra.mxu1 %v313_v23  ;;  %v311_v28 = vld [vmem:[%s1645_s1 + $0x28] sm:$0xff]  ;;  %v310_v29 = vld [vmem:[%s1645_s1 + $0x20] sm:$0xff]  ;;  %vm318_vm3 = vmor %vm316_vm1, %vm317_vm2  ;;  %vm943_vm8 = vcmask 259072   ;;  %vm969_vm9 = vcmask 1041409  }
  0x16   : > { %248 = vmatpush.msra.mxu0 %v185_v1  ;;  %1115 = vmatpush.msra.mxu2 %v185_v1  ;;  %vm320_vm6 = vmor %vm318_vm3, %vm319_vm4 }
  0x17   : > { %1116 = vmatpush.msra.mxu3 %v185_v1  ;;  %s1314_s10 = scalar_lea.vmem %s1644_s0, %s1121_s7  ;;  %413 = vmatpush.msra.mxu1 %v312_v27  ;;  %vm1389_vm7 = vmor %vm320_vm6, %vm321_vm5  ;;  %s1009_s7 = scalar_lea.hbm %s1647_s3, %s1301_s28 }
  0x18   : > { %249 = vmatpush.msra.mxu0 %v184_v2  ;;  %1117 = vmatpush.msra.mxu2 %v184_v2  ;;  %v1317_v4 = vld [vmem:[%s1314_s10] sm:$0xff]  ;;  %v1320_v5 = vld [vmem:[%s1314_s10 + $0x8] sm:$0xff]  ;;  %v1336_v11 = vld [vmem:[%s1314_s10 + $0x18] sm:$0xff]  ;;  %s1012_s11 = sshll.u32 %s1009_s7, 4  ;;  %s1013_s11 = int_to_ptr.hbm [resolvable:$true] %s1012_s11 }
  0x19   : > { %1118 = vmatpush.msra.mxu3 %v184_v2  ;;  %v191_v6 = vrot.slane %v1317_v4, 2  ;;  %v192_v7 = vrot.slane %v1317_v4, 4  ;;  %v193_v8 = vrot.slane %v1317_v4, 6  ;;  %201 = vst [vmem:[#allocation1] ss:$4 sm:$0xff] %v1317_v4  ;;  %v194_v9 = vrot.slane %v1320_v5, 2  ;;  %414 = vmatpush.msra.mxu1 %v311_v28 }
  0x1a   : > { %250 = vmatpush.msra.mxu0 %v183_v3  ;;  %1119 = vmatpush.msra.mxu2 %v183_v3  ;;  %209 = vst [vmem:[#allocation1 + $0x20] ss:$4 sm:$0xff] %v1320_v5  ;;  %v195_v10 = vrot.slane %v1320_v5, 4  ;;  %v196_v12 = vrot.slane %v1336_v11, 2  ;;  %v197_v13 = vrot.slane %v1336_v11, 4  ;;  %v1346_v14 = vld [vmem:[%s1314_s10 + $0x20] sm:$0xff] }
  0x1b   : > { %1120 = vmatpush.msra.mxu3 %v183_v3  ;;  %203 = vst [vmem:[#allocation1 + $0x1] ss:$4 sm:$0xff] %v191_v6  ;;  %v198_v15 = vrot.slane %v1336_v11, 6  ;;  %v199_v17 = vrot.slane %v1346_v14, 2  ;;  %v200_v18 = vrot.slane %v1346_v14, 4  ;;  %415 = vmatpush.msra.mxu1 %v310_v29  ;;  %v325_v39 = vrot.slane %v191_v6, 7 }
  0x1c   : > { %205 = vst [vmem:[#allocation1 + $0x2] ss:$4 sm:$0xff] %v192_v7  ;;  %v328_v40 = vrot.slane %v192_v7, 7  ;;  %v331_v44 = vrot.slane %v193_v8, 7  ;;  %v1086_v45 = vrot.slane %v1317_v4, 9  ;;  %v337_v48 = vrot.slane %v194_v9, 7 }
  0x1d   : > { %207 = vst [vmem:[#allocation1 + $0x3] ss:$4 sm:$0xff] %v193_v8  ;;  %v327_v47 = vrot.slane %v325_v39, 2  ;;  %v334_v50 = vrot.slane %v1320_v5, 7  ;;  %v340_v51 = vrot.slane %v195_v10, 7  ;;  %v1087_v60 = vrot.slane %v1320_v5, 13 }
  0x1e   : > { %211 = vst [vmem:[#allocation1 + $0x21] ss:$4 sm:$0xff] %v194_v9  ;;  %v330_v49 = vrot.slane %v328_v40, 2  ;;  %v333_v52 = vrot.slane %v331_v44, 2  ;;  %v326_v53 = vsel %vm1389_vm7, %v1086_v45, %v325_v39  ;;  %v339_v56 = vrot.slane %v337_v48, 2  ;;  %s1178_s17 = sshra.s32 %s1013_s11, 4  ;;  %s1179_s17 = int_to_ptr.hbm [resolvable:$true] %s1178_s17 }
  0x1f   : > { %213 = vst [vmem:[#allocation1 + $0x22] ss:$4 sm:$0xff] %v195_v10  ;;  %v336_v54 = vrot.slane %v334_v50, 2  ;;  %v329_v55 = vsel %vm1389_vm7, %v327_v47, %v328_v40  ;;  %v342_v59 = vrot.slane %v340_v51, 2  ;;  %v1088_v62 = vrot.slane %v1336_v11, 9  ;;  %v478_v47 = vld [vmem:[%s1645_s1 + $0x58] sm:$0xff]  ;;  %p1185_p0 = scmp.lt.s32.totalorder %s1179_s17, %s1647_s3 }
  0x20   : > { %215 = vst [vmem:[#allocation1 + $0x23] ss:$4 sm:$0xff] %v1336_v11  ;;  %v332_v58 = vsel %vm1389_vm7, %v330_v49, %v331_v44  ;;  %v335_v61 = vsel %vm1389_vm7, %v333_v52, %v334_v50  ;;  %v347_v63 = vrot.slane %v196_v12, 7  ;;  %v350_v0 = vrot.slane %v197_v13, 7  ;;  %549 = vmatpush.msrb.mxu2 %v478_v47  ;;  %v477_v49 = vld [vmem:[%s1645_s1 + $0x50] sm:$0xff]  ;;  %v476_v50 = vld [vmem:[%s1645_s1 + $0x48] sm:$0xff] }
  0x21   : > { %v338_v1 = vsel %vm1389_vm7, %v336_v54, %v337_v48  ;;  %v353_v2 = vrot.slane %v198_v15, 7  ;;  %v341_v3 = vsel %vm1389_vm7, %v339_v56, %v340_v51  ;;  %v356_v6 = vrot.slane %v1346_v14, 7  ;;  %v475_v52 = vld [vmem:[%s1645_s1 + $0x40] sm:$0xff]  ;;  %s1180_s19 = scalar_lea.hbm %s1179_s17, 2 }
  0x22   : > { %v344_v8 = vsel %vm1389_vm7, %v342_v59, %v1087_v60  ;;  %v348_v9 = vsel %vm1389_vm7, %v1088_v62, %v347_v63  ;;  %v349_v10 = vrot.slane %v347_v63, 2  ;;  %550 = vmatpush.msrb.mxu2 %v477_v49  ;;  %v612_v47 = vld [vmem:[%s1645_s1 + $0x60] sm:$0xff]  ;;  %v1509_v49 = vld [vmem:[%s1314_s10 + $0x10] sm:$0x3]  ;;  %p1181_p11 = scmp.ne.s32.totalorder %s1179_s17, %s1180_s19  ;;  %p1186_p1 = scmp.lt.s32.totalorder %s1184_s24, %s1180_s19 }
  0x24   : > { %v216_v16 = vld.sshfl [vmem:[#allocation1] sm:$0xff pattern:$0x73625140]  ;;  %551 = vmatpush.msrb.mxu2 %v476_v50  ;;  %p1182_p12 = pnand %p1181_p11, %p1285_p5  ;;  %p1187_p2 = por %p1186_p1, %p1185_p0 }
  0x25   : > { %1082 = vmatmul.msk.f32.vlgmr.msra.gmra.mxu0 %vm226_vm0, %v216_v16  ;;  %218 = vst [vmem:[#allocation1] ss:$4 sm:$0xff] %v196_v12  ;;  %v352_v12 = vrot.slane %v350_v0, 2  ;;  %v359_v16 = vrot.slane %v199_v17, 7 }
  0x26   : > { %219 = vst [vmem:[#allocation1 + $0x1] ss:$4 sm:$0xff] %v197_v13  ;;  %v362_v13 = vrot.slane %v200_v18, 7  ;;  %552 = vmatpush.msrb.mxu2 %v475_v52  ;;  %p1183_p13 = pneg %p1182_p12 }
  0x27   : > { %v217_v19 = vld.sshfl [vmem:[#allocation1 + $0x20] sm:$0xff pattern:$0x73625140]  ;;  %220 = vst [vmem:[#allocation1 + $0x2] ss:$4 sm:$0xff] %v198_v15  ;;  %v355_v15 = vrot.slane %v353_v2, 2 }
  0x28   : > { %1083 = vmatmul.msk.f32.vlgmr.msra.gmra.mxu2 %vm226_vm0, %v217_v19  ;;  %221 = vst [vmem:[#allocation1 + $0x3] ss:$4 sm:$0xff] %v1346_v14  ;;  %v358_v19 = vrot.slane %v356_v6, 2  ;;  %v364_v23 = vrot.slane %v362_v13, 2  ;;  %p1188_p3 = pnand %p1187_p2, %p1183_p13 }
  0x29   : > { %222 = vst [vmem:[#allocation1 + $0x20] ss:$4 sm:$0xff] %v199_v17 }
  0x2a   : > { %223 = vst [vmem:[#allocation1 + $0x21] ss:$4 sm:$0xff] %v200_v18  ;;  %v357_v18 = vsel %vm1389_vm7, %v355_v15, %v356_v6  ;;  %v360_v17 = vsel %vm1389_vm7, %v358_v19, %v359_v16 }
  0x2f   : > { %v224_v20 = vld.sshfl [vmem:[#allocation1] sm:$0xff pattern:$0x73625140] }
  0x30   : > { %1084 = vmatmul.msk.f32.gmra.mxu2 %vm226_vm0, %v224_v20  ;;  %v351_v20 = vsel %vm1389_vm7, %v349_v10, %v350_v0 }
  0x31   : > { %v225_v21 = vld.sshfl [vmem:[#allocation1 + $0x20] sm:$0xff pattern:$0x73625140] }
  0x32   : > { %1085 = vmatmul.msk.f32.vlgmr.msra.gmra.mxu3 %vm226_vm0, %v225_v21  ;;  %v361_v21 = vrot.slane %v359_v16, 2 }
  0xa2   : > { %v252_v22 = vpop.f32.mrf.mxu0 }
  0xa3   : > { %v268_v24 = vrot.slane %v252_v22, 2  ;;  %v269_v25 = vrot.slane %v252_v22, 4  ;;  %v270_v26 = vrot.slane %v252_v22, 6  ;;  %278 = vst [vmem:[#allocation1] ss:$4 sm:$0xff] %v252_v22  ;;  %v354_v22 = vsel %vm1389_vm7, %v352_v12, %v353_v2 }
  0xa5   : > { %282 = vst [vmem:[#allocation1 + $0x2] ss:$4 sm:$0xff] %v269_v25 }
  0xa6   : > { %284 = vst [vmem:[#allocation1 + $0x3] ss:$4 sm:$0xff] %v270_v26  ;;  %v363_v26 = vsel %vm1389_vm7, %v361_v21, %v362_v13 }
  0xa7   : > { %280 = vst [vmem:[#allocation1 + $0x1] ss:$4 sm:$0xff] %v268_v24  ;;  %v1089_v24 = vrot.slane %v1346_v14, 13 }
  0xa9   : > { %v366_v27 = vsel %vm1389_vm7, %v364_v23, %v1089_v24 }
  0xab   : > { %v255_v30 = vpop.f32.mrf.mxu2 }
  0xac   : > { %v271_v31 = vrot.slane %v255_v30, 2  ;;  %v272_v32 = vrot.slane %v255_v30, 4  ;;  %286 = vst [vmem:[#allocation1 + $0x20] ss:$4 sm:$0xff] %v255_v30  ;;  %v273_v33 = vrot.slane %v255_v30, 6 }
  0xae   : > { %290 = vst [vmem:[#allocation1 + $0x22] ss:$4 sm:$0xff] %v272_v32  ;;  %v1378_v34 = vld.sshfl [vmem:[#allocation1] sm:$0xff pattern:$0x73625140] }
  0xaf   : > { %288 = vst [vmem:[#allocation1 + $0x21] ss:$4 sm:$0xff] %v271_v31 }
  0xb0   : > { %293 = vst [vmem:[#allocation1] ss:$4 sm:$0xff] %v273_v33 }
  0xb3   : > { %v258_v35 = vpop.f32.mrf.mxu2 }
  0xb4   : > { %v274_v36 = vrot.slane %v258_v35, 2  ;;  %v275_v37 = vrot.slane %v258_v35, 4  ;;  %v276_v38 = vrot.slane %v258_v35, 6  ;;  %294 = vst [vmem:[#allocation1 + $0x1] ss:$4 sm:$0xff] %v258_v35 }
  0xb5   : > { %v261_v41 = vpop.f32.mrf.mxu3 }
  0xb6   : > { %295 = vst [vmem:[#allocation1 + $0x2] ss:$4 sm:$0xff] %v274_v36  ;;  %v277_v42 = vrot.slane %v261_v41, 2  ;;  %v1384_v43 = vld.sshfl [vmem:[#allocation1 + $0x20] sm:$0xff pattern:$0x73625140] }
  0xb7   : > { %296 = vst [vmem:[#allocation1 + $0x3] ss:$4 sm:$0xff] %v275_v37 }
  0xb8   : > { %297 = vst [vmem:[#allocation1 + $0x20] ss:$4 sm:$0xff] %v276_v38 }
  0xb9   : > { %298 = vst [vmem:[#allocation1 + $0x21] ss:$4 sm:$0xff] %v261_v41 }
  0xba   : > { %299 = vst [vmem:[#allocation1 + $0x22] ss:$4 sm:$0xff] %v277_v42 }
  0xbe   : > { %v1402_v57 = vld.sshfl [vmem:[#allocation1] sm:$0xff pattern:$0x73625140] }
  0xbf   : > { %367 = vst [vmem:[#allocation1] ss:$4 sm:$0xff] %v326_v53 }
  0xc0   : > { %369 = vst [vmem:[#allocation1 + $0x1] ss:$4 sm:$0xff] %v329_v55 }
  0xc1   : > { %371 = vst [vmem:[#allocation1 + $0x2] ss:$4 sm:$0xff] %v332_v58  ;;  %v1421_v7 = vld.sshfl [vmem:[#allocation1 + $0x20] sm:$0xff pattern:$0x73625140] }
  0xc2   : > { %373 = vst [vmem:[#allocation1 + $0x3] ss:$4 sm:$0xff] %v335_v61 }
  0xc3   : > { %375 = vst [vmem:[#allocation1 + $0x20] ss:$4 sm:$0xff] %v338_v1 }
  0xc4   : > { %377 = vst [vmem:[#allocation1 + $0x21] ss:$4 sm:$0xff] %v341_v3 }
  0xc5   : > { %379 = vst [vmem:[#allocation1 + $0x22] ss:$4 sm:$0xff] %v344_v8 }
  0xc6   : > { %381 = vst [vmem:[#allocation1 + $0x23] ss:$4 sm:$0xff] %v348_v9 }
  0xc9   : > { %v382_v25 = vld.sshfl [vmem:[#allocation1] sm:$0xff pattern:$0x73625140] }
  0xca   : > { %384 = vst [vmem:[#allocation1] ss:$4 sm:$0xff] %v351_v20  ;;  %1090 = vmatmul.msk.f32.vlgmr.msra.gmra.mxu1 %vm226_vm0, %v382_v25 }
  0xcb   : > { %385 = vst [vmem:[#allocation1 + $0x1] ss:$4 sm:$0xff] %v354_v22  ;;  %v181_v22 = vld [vmem:[%s1645_s1 + $0xa0] sm:$0xff] }
  0xcc   : > { %386 = vst [vmem:[#allocation1 + $0x2] ss:$4 sm:$0xff] %v357_v18  ;;  %v306_v23 = vadd.f32 %v1378_v34, %v181_v22 }
  0xcd   : > { %387 = vst [vmem:[#allocation1 + $0x3] ss:$4 sm:$0xff] %v360_v17  ;;  %v383_v28 = vld.sshfl [vmem:[#allocation1 + $0x20] sm:$0xff pattern:$0x73625140] }
  0xce   : > { %388 = vst [vmem:[#allocation1 + $0x20] ss:$4 sm:$0xff] %v363_v26 }
  0xcf   : > { %389 = vst [vmem:[#allocation1 + $0x21] ss:$4 sm:$0xff] %v366_v27 }
  0xd2   : > { %1091 = vmatmul.msk.f32.gmra.mxu1 %vm226_vm0, %v383_v28 }
  0xd4   : > { %v390_v29 = vld.sshfl [vmem:[#allocation1] sm:$0xff pattern:$0x73625140] }
  0xd6   : > { %v391_v30 = vld.sshfl [vmem:[#allocation1 + $0x20] sm:$0xff pattern:$0x73625140] }
  0xda   : > { %1092 = vmatmul.msk.f32.gmra.mxu1 %vm226_vm0, %v390_v29  ;;  %v182_v29 = vld [vmem:[%s1645_s1 + $0xa8] sm:$0x3f] }
  0xdb   : > { %v307_v34 = vadd.f32 %v1384_v43, %v182_v29 }
  0xe2   : > { %1093 = vmatmul.msk.f32.gmra.mxu1 %vm226_vm0, %v391_v30 }
 0x147   : > { %v417_v31 = vpop.f32.mrf.mxu1 }
 0x148   : > { %v433_v32 = vrot.slane %v417_v31, 2  ;;  %v434_v33 = vrot.slane %v417_v31, 4  ;;  %v435_v35 = vrot.slane %v417_v31, 6  ;;  %443 = vst [vmem:[#allocation1] ss:$4 sm:$0xff] %v417_v31 }
 0x14a   : > { %445 = vst [vmem:[#allocation1 + $0x1] ss:$4 sm:$0xff] %v433_v32 }
 0x14b   : > { %447 = vst [vmem:[#allocation1 + $0x2] ss:$4 sm:$0xff] %v434_v33 }
 0x14c   : > { %449 = vst [vmem:[#allocation1 + $0x3] ss:$4 sm:$0xff] %v435_v35 }
 0x14f   : > { %v420_v36 = vpop.f32.mrf.mxu1 }
 0x150   : > { %v436_v37 = vrot.slane %v420_v36, 2  ;;  %v437_v38 = vrot.slane %v420_v36, 4  ;;  %v438_v39 = vrot.slane %v420_v36, 6  ;;  %451 = vst [vmem:[#allocation1 + $0x20] ss:$4 sm:$0xff] %v420_v36 }
 0x152   : > { %453 = vst [vmem:[#allocation1 + $0x21] ss:$4 sm:$0xff] %v436_v37 }
 0x153   : > { %455 = vst [vmem:[#allocation1 + $0x22] ss:$4 sm:$0xff] %v437_v38  ;;  %v1448_v40 = vld.sshfl [vmem:[#allocation1] sm:$0xff pattern:$0x73625140] }
 0x154   : > { %458 = vst [vmem:[#allocation1] ss:$4 sm:$0xff] %v438_v39  ;;  %v471_v24 = vadd.f32 %v1448_v40, %v306_v23  ;;  %v308_v39 = vadd.f32 %v1402_v57, %v181_v22  ;;  %v614_v57 = vld [vmem:[%s1645_s1 + $0x70] sm:$0xff] }
 0x157   : > { %v423_v41 = vpop.f32.mrf.mxu1 }
 0x158   : > { %v439_v42 = vrot.slane %v423_v41, 2  ;;  %v440_v44 = vrot.slane %v423_v41, 4  ;;  %v441_v45 = vrot.slane %v423_v41, 6  ;;  %459 = vst [vmem:[#allocation1 + $0x1] ss:$4 sm:$0xff] %v423_v41 }
 0x15a   : > { %460 = vst [vmem:[#allocation1 + $0x2] ss:$4 sm:$0xff] %v439_v42  ;;  %v1453_v48 = vld.sshfl [vmem:[#allocation1 + $0x20] sm:$0xff pattern:$0x73625140]  ;;  %v615_v42 = vld [vmem:[%s1645_s1 + $0x78] sm:$0xff] }
 0x15b   : > { %461 = vst [vmem:[#allocation1 + $0x3] ss:$4 sm:$0xff] %v440_v44  ;;  %v472_v35 = vadd.f32 %v1453_v48, %v307_v34  ;;  %736 = vmatpush.msrb.mxu3 %v615_v42  ;;  %v309_v48 = vadd.f32 %v1421_v7, %v182_v29 }
 0x15c   : > { %462 = vst [vmem:[#allocation1 + $0x20] ss:$4 sm:$0xff] %v441_v45  ;;  %v613_v45 = vld [vmem:[%s1645_s1 + $0x68] sm:$0xff] }
 0x15d   : > { %737 = vmatpush.msrb.mxu3 %v614_v57 }
 0x15f   : > { %v426_v51 = vpop.f32.mrf.mxu1  ;;  %738 = vmatpush.msrb.mxu3 %v613_v45 }
 0x160   : > { %v442_v53 = vrot.slane %v426_v51, 2  ;;  %463 = vst [vmem:[#allocation1 + $0x21] ss:$4 sm:$0xff] %v426_v51 }
 0x161   : > { %739 = vmatpush.msrb.mxu3 %v612_v47 }
 0x162   : > { %v1464_v54 = vld.sshfl [vmem:[#allocation1] sm:$0xff pattern:$0x73625140]  ;;  %464 = vst [vmem:[#allocation1 + $0x22] ss:$4 sm:$0xff] %v442_v53 }
 0x163   : > { %479 = vst.sshfl [vmem:[#allocation1] sm:$0xff pattern:$0x73625140] %v1317_v4  ;;  %v473_v43 = vadd.f32 %v1464_v54, %v308_v39 }
 0x169   : > { %v1467_v55 = vld.sshfl [vmem:[#allocation1 + $0x20] sm:$0xff pattern:$0x73625140] }
 0x16a   : > { %v482_v56 = vld [vmem:[#allocation1 + $0x1] ss:$4 sm:$0xff]  ;;  %v484_v58 = vld [vmem:[#allocation1 + $0x2] ss:$4 sm:$0xff]  ;;  %v486_v59 = vld [vmem:[#allocation1 + $0x3] ss:$4 sm:$0xff]  ;;  %v474_v50 = vadd.f32 %v1467_v55, %v309_v48 }
 0x16b   : > { %495 = vst.sshfl [vmem:[#allocation1] sm:$0xff pattern:$0x73625140] %v1336_v11 }
 0x16c   : > { %504 = vst [vmem:[#allocation1] ss:$4 sm:$0xff] %v482_v56 }
 0x16d   : > { %480 = vst.sshfl [vmem:[#allocation1 + $0x20] sm:$0xff pattern:$0x73625140] %v1320_v5 }
 0x172   : > { %v497_v60 = vld [vmem:[#allocation1 + $0x1] ss:$4 sm:$0xff]  ;;  %v498_v61 = vld [vmem:[#allocation1 + $0x2] ss:$4 sm:$0xff]  ;;  %v499_v62 = vld [vmem:[#allocation1 + $0x3] ss:$4 sm:$0xff] }
 0x173   : > { %506 = vst [vmem:[#allocation1 + $0x1] ss:$4 sm:$0xff] %v484_v58 }
 0x174   : > { %508 = vst [vmem:[#allocation1 + $0x2] ss:$4 sm:$0xff] %v486_v59  ;;  %v488_v63 = vld [vmem:[#allocation1 + $0x20] ss:$4 sm:$0xff]  ;;  %v490_v0 = vld [vmem:[#allocation1 + $0x21] ss:$4 sm:$0xff] }
 0x175   : > { %v492_v1 = vld [vmem:[#allocation1 + $0x22] ss:$4 sm:$0xff]  ;;  %v494_v2 = vld [vmem:[#allocation1 + $0x23] ss:$4 sm:$0xff]  ;;  %510 = vst [vmem:[#allocation1 + $0x3] ss:$4 sm:$0xff] %v488_v63 }
 0x176   : > { %496 = vst.sshfl [vmem:[#allocation1 + $0x20] sm:$0xff pattern:$0x73625140] %v1346_v14 }
 0x17c   : > { %v519_v3 = vld.sshfl [vmem:[#allocation1] sm:$0xff pattern:$0x73625140] }
 0x17d   : > { %v500_v6 = vld [vmem:[#allocation1 + $0x20] ss:$4 sm:$0xff]  ;;  %v501_v8 = vld [vmem:[#allocation1 + $0x21] ss:$4 sm:$0xff]  ;;  %v502_v9 = vld [vmem:[#allocation1 + $0x22] ss:$4 sm:$0xff]  ;;  %1094 = vmatmul.msk.f32.vlgmr.msrb.gmra.mxu2 %vm226_vm0, %v519_v3 }
 0x17e   : > { %v503_v10 = vld [vmem:[#allocation1 + $0x23] ss:$4 sm:$0xff]  ;;  %514 = vst [vmem:[#allocation1 + $0x21] ss:$4 sm:$0xff] %v492_v1 }
 0x17f   : > { %516 = vst [vmem:[#allocation1 + $0x22] ss:$4 sm:$0xff] %v494_v2 }
 0x180   : > { %512 = vst [vmem:[#allocation1 + $0x20] ss:$4 sm:$0xff] %v490_v0 }
 0x181   : > { %518 = vst [vmem:[#allocation1 + $0x23] ss:$4 sm:$0xff] %v497_v60 }
 0x182   : > { %521 = vst [vmem:[#allocation1] ss:$4 sm:$0xff] %v498_v61 }
 0x183   : > { %522 = vst [vmem:[#allocation1 + $0x1] ss:$4 sm:$0xff] %v499_v62 }
 0x184   : > { %523 = vst [vmem:[#allocation1 + $0x2] ss:$4 sm:$0xff] %v500_v6 }
 0x185   : > { %524 = vst [vmem:[#allocation1 + $0x3] ss:$4 sm:$0xff] %v501_v8  ;;  %v1519_v8 = vld [vmem:[%s1314_s10 + $0x28] sm:$0x3] }
 0x188   : > { %v520_v12 = vld.sshfl [vmem:[#allocation1 + $0x20] sm:$0xff pattern:$0x73625140] }
 0x189   : > { %1095 = vmatmul.msk.f32.gmra.mxu2 %vm226_vm0, %v520_v12  ;;  %525 = vst [vmem:[#allocation1 + $0x20] ss:$4 sm:$0xff] %v502_v9 }
 0x18a   : > { %526 = vst [vmem:[#allocation1 + $0x21] ss:$4 sm:$0xff] %v503_v10 }
 0x18c   : > { %v527_v13 = vld.sshfl [vmem:[#allocation1] sm:$0xff pattern:$0x73625140] }
 0x191   : > { %1096 = vmatmul.msk.f32.gmra.mxu2 %vm226_vm0, %v527_v13  ;;  %v528_v15 = vld.sshfl [vmem:[#allocation1 + $0x20] sm:$0xff pattern:$0x73625140] }
 0x199   : > { %1097 = vmatmul.msk.f32.gmra.mxu2 %vm226_vm0, %v528_v15 }
 0x200   : > { %v554_v16 = vpop.f32.mrf.mxu2 }
 0x201   : > { %v570_v19 = vrot.slane %v554_v16, 2  ;;  %v571_v20 = vrot.slane %v554_v16, 4  ;;  %v572_v21 = vrot.slane %v554_v16, 6  ;;  %580 = vst [vmem:[#allocation1] ss:$4 sm:$0xff] %v554_v16 }
 0x203   : > { %582 = vst [vmem:[#allocation1 + $0x1] ss:$4 sm:$0xff] %v570_v19 }
 0x204   : > { %584 = vst [vmem:[#allocation1 + $0x2] ss:$4 sm:$0xff] %v571_v20 }
 0x205   : > { %586 = vst [vmem:[#allocation1 + $0x3] ss:$4 sm:$0xff] %v572_v21 }
 0x20c   : > { %v557_v18 = vpop.f32.mrf.mxu2  ;;  %v593_v25 = vld.sshfl [vmem:[#allocation1] sm:$0xff pattern:$0x73625140] }
 0x20d   : > { %v573_v17 = vrot.slane %v557_v18, 2  ;;  %v574_v26 = vrot.slane %v557_v18, 4  ;;  %v575_v27 = vrot.slane %v557_v18, 6  ;;  %588 = vst [vmem:[#allocation1 + $0x20] ss:$4 sm:$0xff] %v557_v18  ;;  %v1481_v28 = vadd.f32 %v593_v25, %v471_v24 }
 0x20f   : > { %590 = vst [vmem:[#allocation1 + $0x21] ss:$4 sm:$0xff] %v573_v17 }
 0x210   : > { %592 = vst [vmem:[#allocation1 + $0x22] ss:$4 sm:$0xff] %v574_v26 }
 0x211   : > { %595 = vst [vmem:[#allocation1] ss:$4 sm:$0xff] %v575_v27 }
 0x214   : > { %v560_v30 = vpop.f32.mrf.mxu2 }
 0x215   : > { %v576_v31 = vrot.slane %v560_v30, 2  ;;  %v577_v32 = vrot.slane %v560_v30, 4  ;;  %v578_v33 = vrot.slane %v560_v30, 6  ;;  %596 = vst [vmem:[#allocation1 + $0x1] ss:$4 sm:$0xff] %v560_v30 }
 0x217   : > { %597 = vst [vmem:[#allocation1 + $0x2] ss:$4 sm:$0xff] %v576_v31  ;;  %v594_v36 = vld.sshfl [vmem:[#allocation1 + $0x20] sm:$0xff pattern:$0x73625140] }
 0x218   : > { %598 = vst [vmem:[#allocation1 + $0x3] ss:$4 sm:$0xff] %v577_v32  ;;  %v1488_v37 = vadd.f32 %v594_v36, %v472_v35 }
 0x219   : > { %599 = vst [vmem:[#allocation1 + $0x20] ss:$4 sm:$0xff] %v578_v33 }
 0x21c   : > { %v563_v38 = vpop.f32.mrf.mxu2 }
 0x21d   : > { %v579_v40 = vrot.slane %v563_v38, 2  ;;  %600 = vst [vmem:[#allocation1 + $0x21] ss:$4 sm:$0xff] %v563_v38 }
 0x21f   : > { %v602_v41 = vld.sshfl [vmem:[#allocation1] sm:$0xff pattern:$0x73625140]  ;;  %601 = vst [vmem:[#allocation1 + $0x22] ss:$4 sm:$0xff] %v579_v40 }
 0x220   : > { %618 = vst.sshfl [vmem:[#allocation1] sm:$0xff pattern:$0x73625140] %v1317_v4  ;;  %v1496_v44 = vadd.f32 %v602_v41, %v473_v43 }
 0x226   : > { %v603_v51 = vld.sshfl [vmem:[#allocation1 + $0x20] sm:$0xff pattern:$0x73625140] }
 0x227   : > { %v621_v52 = vld [vmem:[#allocation1 + $0x1] ss:$4 sm:$0xff]  ;;  %v623_v53 = vld [vmem:[#allocation1 + $0x2] ss:$4 sm:$0xff]  ;;  %v625_v54 = vld [vmem:[#allocation1 + $0x3] ss:$4 sm:$0xff]  ;;  %v1512_v56 = vadd.f32 %v603_v51, %v474_v50 }
 0x228   : > { %634 = vst.sshfl [vmem:[#allocation1] sm:$0xff pattern:$0x73625140] %v1509_v49  ;;  %v649_v7 = vrot.slane %v623_v53, 7  ;;  %v1098_v63 = vrot.slane %v621_v52, 9  ;;  %v652_v6 = vrot.slane %v625_v54, 7 }
 0x229   : > { %619 = vst.sshfl [vmem:[#allocation1 + $0x20] sm:$0xff pattern:$0x73625140] %v1320_v5 }
 0x22a   : > { %v651_v1 = vrot.slane %v649_v7, 2  ;;  %v650_v12 = vsel %vm1389_vm7, %v1098_v63, %v649_v7  ;;  %v654_v29 = vrot.slane %v652_v6, 2 }
 0x22c   : > { %v653_v19 = vsel %vm1389_vm7, %v651_v1, %v652_v6 }
 0x22f   : > { %v635_v58 = vld [vmem:[#allocation1] ss:$4 sm:$0xff] }
 0x230   : > { %640 = vst.sshfl [vmem:[#allocation1] sm:$0xff pattern:$0x73625140] %v1346_v14  ;;  %v627_v59 = vld [vmem:[#allocation1 + $0x20] ss:$4 sm:$0xff]  ;;  %v667_v21 = vrot.slane %v635_v58, 7 }
 0x231   : > { %v629_v60 = vld [vmem:[#allocation1 + $0x21] ss:$4 sm:$0xff]  ;;  %v631_v61 = vld [vmem:[#allocation1 + $0x22] ss:$4 sm:$0xff]  ;;  %v633_v55 = vld [vmem:[#allocation1 + $0x23] ss:$4 sm:$0xff] }
 0x232   : > { %636 = vst.sshfl [vmem:[#allocation1 + $0x20] sm:$0xff pattern:$0x73625140] %v1336_v11  ;;  %v655_v62 = vrot.slane %v627_v59, 7  ;;  %v661_v0 = vrot.slane %v631_v61, 7  ;;  %v664_v2 = vrot.slane %v633_v55, 7 }
 0x233   : > { %v658_v13 = vrot.slane %v629_v60, 7 }
 0x234   : > { %v657_v3 = vrot.slane %v655_v62, 2  ;;  %v663_v15 = vrot.slane %v661_v0, 2  ;;  %v666_v20 = vrot.slane %v664_v2, 2  ;;  %v656_v31 = vsel %vm1389_vm7, %v654_v29, %v655_v62 }
 0x235   : > { %v660_v32 = vrot.slane %v658_v13, 2 }
 0x236   : > { %v659_v24 = vsel %vm1389_vm7, %v657_v3, %v658_v13  ;;  %v665_v26 = vsel %vm1389_vm7, %v663_v15, %v664_v2  ;;  %v668_v30 = vsel %vm1389_vm7, %v666_v20, %v667_v21 }
 0x237   : > { %v642_v9 = vld [vmem:[#allocation1] ss:$4 sm:$0xff]  ;;  %v643_v10 = vld [vmem:[#allocation1 + $0x1] ss:$4 sm:$0xff]  ;;  %v645_v16 = vld [vmem:[#allocation1 + $0x3] ss:$4 sm:$0xff]  ;;  %v662_v39 = vsel %vm1389_vm7, %v660_v32, %v661_v0 }
 0x238   : > { %691 = vst [vmem:[#allocation1] ss:$4 sm:$0xff] %v650_v12  ;;  %v644_v27 = vld [vmem:[#allocation1 + $0x2] ss:$4 sm:$0xff]  ;;  %v677_v35 = vrot.slane %v642_v9, 7  ;;  %v680_v36 = vrot.slane %v643_v10, 7 }
 0x239   : > { %693 = vst [vmem:[#allocation1 + $0x1] ss:$4 sm:$0xff] %v653_v19  ;;  %v637_v22 = vld [vmem:[#allocation1 + $0x21] ss:$4 sm:$0xff]  ;;  %v638_v23 = vld [vmem:[#allocation1 + $0x22] ss:$4 sm:$0xff] }
 0x23a   : > { %v639_v18 = vld [vmem:[#allocation1 + $0x23] ss:$4 sm:$0xff]  ;;  %v1099_v25 = vrot.slane %v637_v22, 9  ;;  %v671_v17 = vrot.slane %v638_v23, 7  ;;  %697 = vst [vmem:[#allocation1 + $0x3] ss:$4 sm:$0xff] %v659_v24 }
 0x23b   : > { %641 = vst.sshfl [vmem:[#allocation1 + $0x20] sm:$0xff pattern:$0x73625140] %v1519_v8  ;;  %v674_v33 = vrot.slane %v639_v18, 7  ;;  %v683_v43 = vrot.slane %v644_v27, 7  ;;  %v679_v42 = vrot.slane %v677_v35, 2 }
 0x23c   : > { %v672_v34 = vsel %vm1389_vm7, %v1099_v25, %v671_v17  ;;  %701 = vst [vmem:[#allocation1 + $0x21] ss:$4 sm:$0xff] %v665_v26  ;;  %v673_v40 = vrot.slane %v671_v17, 2  ;;  %v682_v57 = vrot.slane %v680_v36, 2  ;;  %v686_v45 = vrot.slane %v645_v16, 7  ;;  %v801_v24 = vld [vmem:[%s1645_s1 + $0x90] sm:$0xff] }
 0x23d   : > { %703 = vst [vmem:[#allocation1 + $0x22] ss:$4 sm:$0xff] %v668_v30  ;;  %v676_v41 = vrot.slane %v674_v33, 2  ;;  %v685_v50 = vrot.slane %v683_v43, 2  ;;  %v681_v53 = vsel %vm1389_vm7, %v679_v42, %v680_v36  ;;  %v799_v25 = vld [vmem:[%s1645_s1 + $0x80] sm:$0xff] }
 0x23e   : > { %705 = vst [vmem:[#allocation1 + $0x23] ss:$4 sm:$0xff] %v672_v34  ;;  %v675_v48 = vsel %vm1389_vm7, %v673_v40, %v674_v33  ;;  %v684_v54 = vsel %vm1389_vm7, %v682_v57, %v683_v43  ;;  %v688_v58 = vrot.slane %v686_v45, 2  ;;  %v963_v40 = vld [vmem:[%s1646_s2 + $0x10] sm:$0xff]  ;;  %v962_v43 = vld [vmem:[%s1646_s2 + $0x8] sm:$0xff] }
 0x23f   : > { %695 = vst [vmem:[#allocation1 + $0x2] ss:$4 sm:$0xff] %v656_v31  ;;  %v678_v51 = vsel %vm1389_vm7, %v676_v41, %v677_v35  ;;  %v687_v59 = vsel %vm1389_vm7, %v685_v50, %v686_v45  ;;  %v961_v41 = vld [vmem:[%s1646_s2] sm:$0xff] }
 0x242   : > { %v646_v38 = vld [vmem:[#allocation1 + $0x20] ss:$4 sm:$0xff] }
 0x243   : > { %699 = vst [vmem:[#allocation1 + $0x20] ss:$4 sm:$0xff] %v662_v39  ;;  %v689_v52 = vrot.slane %v646_v38, 7  ;;  %v964_v39 = vld [vmem:[%s1646_s2 + $0x18] sm:$0xff] }
 0x244   : > { %985 = vmatpush.msrb.mxu1 %v964_v39 }
 0x245   : > { %v690_v60 = vsel %vm1389_vm7, %v688_v58, %v689_v52 }
 0x246   : > { %v706_v47 = vld.sshfl [vmem:[#allocation1] sm:$0xff pattern:$0x73625140]  ;;  %986 = vmatpush.msrb.mxu1 %v963_v40 }
 0x247   : > { %1100 = vmatmul.msk.f32.vlgmr.msrb.gmra.mxu3 %vm226_vm0, %v706_v47  ;;  %708 = vst [vmem:[#allocation1] ss:$4 sm:$0xff] %v675_v48 }
 0x248   : > { %709 = vst [vmem:[#allocation1 + $0x1] ss:$4 sm:$0xff] %v678_v51  ;;  %987 = vmatpush.msrb.mxu1 %v962_v43 }
 0x249   : > { %710 = vst [vmem:[#allocation1 + $0x2] ss:$4 sm:$0xff] %v681_v53 }
 0x24a   : > { %v707_v7 = vld.sshfl [vmem:[#allocation1 + $0x20] sm:$0xff pattern:$0x73625140]  ;;  %711 = vst [vmem:[#allocation1 + $0x3] ss:$4 sm:$0xff] %v684_v54  ;;  %988 = vmatpush.msrb.mxu1 %v961_v41 }
 0x24b   : > { %712 = vst [vmem:[#allocation1 + $0x20] ss:$4 sm:$0xff] %v687_v59 }
 0x24c   : > { %713 = vst [vmem:[#allocation1 + $0x21] ss:$4 sm:$0xff] %v690_v60 }
 0x24f   : > { %1101 = vmatmul.msk.f32.gmra.mxu3 %vm226_vm0, %v707_v7 }
 0x251   : > { %v714_v61 = vld.sshfl [vmem:[#allocation1] sm:$0xff pattern:$0x73625140] }
 0x253   : > { %v715_v55 = vld.sshfl [vmem:[#allocation1 + $0x20] sm:$0xff pattern:$0x73625140] }
 0x257   : > { %1102 = vmatmul.msk.f32.gmra.mxu3 %vm226_vm0, %v714_v61 }
 0x25f   : > { %1103 = vmatmul.msk.f32.gmra.mxu3 %vm226_vm0, %v715_v55 }
 0x2ca   : > { %v741_v62 = vpop.f32.mrf.mxu3 }
 0x2cb   : > { %v757_v63 = vrot.slane %v741_v62, 2  ;;  %v758_v0 = vrot.slane %v741_v62, 4  ;;  %v759_v1 = vrot.slane %v741_v62, 6  ;;  %767 = vst [vmem:[#allocation1] ss:$4 sm:$0xff] %v741_v62 }
 0x2cd   : > { %769 = vst [vmem:[#allocation1 + $0x1] ss:$4 sm:$0xff] %v757_v63 }
 0x2ce   : > { %771 = vst [vmem:[#allocation1 + $0x2] ss:$4 sm:$0xff] %v758_v0 }
 0x2cf   : > { %773 = vst [vmem:[#allocation1 + $0x3] ss:$4 sm:$0xff] %v759_v1 }
 0x2d2   : > { %v744_v46 = vpop.f32.mrf.mxu3 }
 0x2d3   : > { %v760_v2 = vrot.slane %v744_v46, 2  ;;  %v761_v3 = vrot.slane %v744_v46, 4  ;;  %v762_v6 = vrot.slane %v744_v46, 6  ;;  %775 = vst [vmem:[#allocation1 + $0x20] ss:$4 sm:$0xff] %v744_v46 }
 0x2d5   : > { %777 = vst [vmem:[#allocation1 + $0x21] ss:$4 sm:$0xff] %v760_v2 }
 0x2d6   : > { %v780_v9 = vld.sshfl [vmem:[#allocation1] sm:$0xff pattern:$0x73625140]  ;;  %779 = vst [vmem:[#allocation1 + $0x22] ss:$4 sm:$0xff] %v761_v3 }
 0x2d7   : > { %782 = vst [vmem:[#allocation1] ss:$4 sm:$0xff] %v762_v6  ;;  %v1555_v10 = vadd.f32 %v780_v9, %v1481_v28  ;;  %v802_v28 = vld [vmem:[%s1645_s1 + $0x98] sm:$0xff] }
 0x2d8   : > { %875 = vmatpush.msrb.mxu0 %v802_v28 }
 0x2da   : > { %v747_v12 = vpop.f32.mrf.mxu3  ;;  %876 = vmatpush.msrb.mxu0 %v801_v24 }
 0x2db   : > { %v763_v13 = vrot.slane %v747_v12, 2  ;;  %v764_v15 = vrot.slane %v747_v12, 4  ;;  %v765_v16 = vrot.slane %v747_v12, 6  ;;  %783 = vst [vmem:[#allocation1 + $0x1] ss:$4 sm:$0xff] %v747_v12 }
 0x2dd   : > { %784 = vst [vmem:[#allocation1 + $0x2] ss:$4 sm:$0xff] %v763_v13  ;;  %v781_v19 = vld.sshfl [vmem:[#allocation1 + $0x20] sm:$0xff pattern:$0x73625140] }
 0x2de   : > { %785 = vst [vmem:[#allocation1 + $0x3] ss:$4 sm:$0xff] %v764_v15  ;;  %v1558_v20 = vadd.f32 %v781_v19, %v1488_v37  ;;  %v800_v37 = vld [vmem:[%s1645_s1 + $0x88] sm:$0xff] }
 0x2df   : > { %786 = vst [vmem:[#allocation1 + $0x20] ss:$4 sm:$0xff] %v765_v16  ;;  %877 = vmatpush.msrb.mxu0 %v800_v37 }
 0x2e1   : > { %878 = vmatpush.msrb.mxu0 %v799_v25 }
 0x2e2   : > { %v750_v21 = vpop.f32.mrf.mxu3 }
 0x2e3   : > { %v766_v22 = vrot.slane %v750_v21, 2  ;;  %787 = vst [vmem:[#allocation1 + $0x21] ss:$4 sm:$0xff] %v750_v21 }
 0x2e5   : > { %v789_v23 = vld.sshfl [vmem:[#allocation1] sm:$0xff pattern:$0x73625140]  ;;  %788 = vst [vmem:[#allocation1 + $0x22] ss:$4 sm:$0xff] %v766_v22 }
 0x2e6   : > { %803 = vst.sshfl [vmem:[#allocation1] sm:$0xff pattern:$0x73625140] %v1317_v4  ;;  %v1571_v18 = vadd.f32 %v789_v23, %v1496_v44 }
 0x2ec   : > { %v790_v17 = vld.sshfl [vmem:[#allocation1 + $0x20] sm:$0xff pattern:$0x73625140] }
 0x2ed   : > { %v806_v26 = vld [vmem:[#allocation1 + $0x2] ss:$4 sm:$0xff]  ;;  %v808_v27 = vld [vmem:[#allocation1 + $0x3] ss:$4 sm:$0xff]  ;;  %v1577_v29 = vadd.f32 %v790_v17, %v1512_v56 }
 0x2ee   : > { %817 = vst.sshfl [vmem:[#allocation1] sm:$0xff pattern:$0x73625140] %v1509_v49 }
 0x2ef   : > { %804 = vst.sshfl [vmem:[#allocation1 + $0x20] sm:$0xff pattern:$0x73625140] %v1320_v5 }
 0x2f5   : > { %v818_v4 = vld [vmem:[#allocation1] ss:$4 sm:$0xff] }
 0x2f6   : > { %822 = vst.sshfl [vmem:[#allocation1] sm:$0xff pattern:$0x73625140] %v1346_v14  ;;  %v810_v44 = vld [vmem:[#allocation1 + $0x20] ss:$4 sm:$0xff] }
 0x2f7   : > { %v812_v30 = vld [vmem:[#allocation1 + $0x21] ss:$4 sm:$0xff]  ;;  %v814_v34 = vld [vmem:[#allocation1 + $0x22] ss:$4 sm:$0xff]  ;;  %v816_v31 = vld [vmem:[#allocation1 + $0x23] ss:$4 sm:$0xff] }
 0x2f8   : > { %819 = vst.sshfl [vmem:[#allocation1 + $0x20] sm:$0xff pattern:$0x73625140] %v1336_v11 }
 0x2fd   : > { %v824_v32 = vld [vmem:[#allocation1] ss:$4 sm:$0xff]  ;;  %v826_v33 = vld [vmem:[#allocation1 + $0x1] ss:$4 sm:$0xff]  ;;  %v828_v35 = vld [vmem:[#allocation1 + $0x3] ss:$4 sm:$0xff] }
 0x2fe   : > { %830 = vst [vmem:[#allocation1] ss:$4 sm:$0xff] %v806_v26  ;;  %v827_v38 = vld [vmem:[#allocation1 + $0x2] ss:$4 sm:$0xff] }
 0x2ff   : > { %832 = vst [vmem:[#allocation1 + $0x1] ss:$4 sm:$0xff] %v808_v27  ;;  %v820_v56 = vld [vmem:[#allocation1 + $0x22] ss:$4 sm:$0xff]  ;;  %v821_v36 = vld [vmem:[#allocation1 + $0x23] ss:$4 sm:$0xff] }
 0x300   : > { %823 = vst.sshfl [vmem:[#allocation1 + $0x20] sm:$0xff pattern:$0x73625140] %v1519_v8 }
 0x301   : > { %836 = vst [vmem:[#allocation1 + $0x3] ss:$4 sm:$0xff] %v812_v30 }
 0x302   : > { %840 = vst [vmem:[#allocation1 + $0x21] ss:$4 sm:$0xff] %v816_v31 }
 0x303   : > { %834 = vst [vmem:[#allocation1 + $0x2] ss:$4 sm:$0xff] %v810_v44  ;;  %v1163_v44 = vld [vmem:[%s1646_s2 + $0x20] ss:$0 sm:$0xff] }
 0x304   : > { %842 = vst [vmem:[#allocation1 + $0x22] ss:$4 sm:$0xff] %v818_v4 }
 0x305   : > { %844 = vst [vmem:[#allocation1 + $0x23] ss:$4 sm:$0xff] %v820_v56 }
 0x307   : > { %v829_v5 = vld [vmem:[#allocation1 + $0x20] ss:$4 sm:$0xff] }
 0x308   : > { %838 = vst [vmem:[#allocation1 + $0x20] ss:$4 sm:$0xff] %v814_v34 }
 0x30a   : > { %v845_v14 = vld.sshfl [vmem:[#allocation1] sm:$0xff pattern:$0x73625140] }
 0x30b   : > { %1104 = vmatmul.msk.f32.vlgmr.msrb.gmra.mxu0 %vm226_vm0, %v845_v14  ;;  %847 = vst [vmem:[#allocation1] ss:$4 sm:$0xff] %v821_v36 }
 0x30c   : > { %848 = vst [vmem:[#allocation1 + $0x1] ss:$4 sm:$0xff] %v824_v32 }
 0x30d   : > { %849 = vst [vmem:[#allocation1 + $0x2] ss:$4 sm:$0xff] %v826_v33 }
 0x30e   : > { %850 = vst [vmem:[#allocation1 + $0x3] ss:$4 sm:$0xff] %v827_v38 }
 0x30f   : > { %v846_v11 = vld.sshfl [vmem:[#allocation1 + $0x20] sm:$0xff pattern:$0x73625140] }
 0x310   : > { %851 = vst [vmem:[#allocation1 + $0x20] ss:$4 sm:$0xff] %v828_v35 }
 0x311   : > { %852 = vst [vmem:[#allocation1 + $0x21] ss:$4 sm:$0xff] %v829_v5 }
 0x313   : > { %1105 = vmatmul.msk.f32.gmra.mxu0 %vm226_vm0, %v846_v11 }
 0x315   : > { %v853_v49 = vld.sshfl [vmem:[#allocation1] sm:$0xff pattern:$0x73625140] }
 0x318   : > { %v854_v8 = vld.sshfl [vmem:[#allocation1 + $0x20] sm:$0xff pattern:$0x73625140] }
 0x31b   : > { %1106 = vmatmul.msk.f32.gmra.mxu0 %vm226_vm0, %v853_v49 }
 0x323   : > { %1107 = vmatmul.msk.f32.gmra.mxu0 %vm226_vm0, %v854_v8 }
 0x388   : > { %v880_v42 = vpop.f32.mrf.mxu0 }
 0x389   : > { %v896_v57 = vrot.slane %v880_v42, 2  ;;  %v897_v45 = vrot.slane %v880_v42, 4  ;;  %v898_v47 = vrot.slane %v880_v42, 6  ;;  %906 = vst [vmem:[#allocation1] ss:$4 sm:$0xff] %v880_v42 }
 0x38b   : > { %908 = vst [vmem:[#allocation1 + $0x1] ss:$4 sm:$0xff] %v896_v57 }
 0x38c   : > { %910 = vst [vmem:[#allocation1 + $0x2] ss:$4 sm:$0xff] %v897_v45 }
 0x38d   : > { %912 = vst [vmem:[#allocation1 + $0x3] ss:$4 sm:$0xff] %v898_v47 }
 0x390   : > { %v883_v48 = vpop.f32.mrf.mxu0 }
 0x391   : > { %v899_v50 = vrot.slane %v883_v48, 2  ;;  %v900_v51 = vrot.slane %v883_v48, 4  ;;  %v901_v52 = vrot.slane %v883_v48, 6  ;;  %914 = vst [vmem:[#allocation1 + $0x20] ss:$4 sm:$0xff] %v883_v48 }
 0x393   : > { %916 = vst [vmem:[#allocation1 + $0x21] ss:$4 sm:$0xff] %v899_v50 }
 0x394   : > { %918 = vst [vmem:[#allocation1 + $0x22] ss:$4 sm:$0xff] %v900_v51  ;;  %v919_v53 = vld.sshfl [vmem:[#allocation1] sm:$0xff pattern:$0x73625140] }
 0x395   : > { %921 = vst [vmem:[#allocation1] ss:$4 sm:$0xff] %v901_v52  ;;  %v934_v58 = vadd.f32 %v919_v53, %v1555_v10 }
 0x397   : > { %v938_v62 = vmax.f32 %v934_v58, 0.0 }
 0x398   : > { %v886_v54 = vpop.f32.mrf.mxu0 }
 0x399   : > { %v902_v7 = vrot.slane %v886_v54, 2  ;;  %v903_v59 = vrot.slane %v886_v54, 4  ;;  %v904_v60 = vrot.slane %v886_v54, 6  ;;  %922 = vst [vmem:[#allocation1 + $0x1] ss:$4 sm:$0xff] %v886_v54  ;;  %v942_v1 = vsel %vm226_vm0, %v938_v62, -inf }
 0x39b   : > { %v920_v61 = vld.sshfl [vmem:[#allocation1 + $0x20] sm:$0xff pattern:$0x73625140]  ;;  %923 = vst [vmem:[#allocation1 + $0x2] ss:$4 sm:$0xff] %v902_v7 }
 0x39c   : > { %924 = vst [vmem:[#allocation1 + $0x3] ss:$4 sm:$0xff] %v903_v59  ;;  %v935_v55 = vadd.f32 %v920_v61, %v1558_v20 }
 0x39d   : > { %925 = vst [vmem:[#allocation1 + $0x20] ss:$4 sm:$0xff] %v904_v60 }
 0x39e   : > { %v939_v63 = vmax.f32 %v935_v55, 0.0 }
 0x3a0   : > { %v889_v0 = vpop.f32.mrf.mxu0  ;;  %v944_v46 = vsel %vm943_vm8, %v939_v63, -inf }
 0x3a1   : > { %v905_v2 = vrot.slane %v889_v0, 2  ;;  %926 = vst [vmem:[#allocation1 + $0x21] ss:$4 sm:$0xff] %v889_v0  ;;  %v945_v3 = vmax.f32 %v942_v1, %v944_v46 }
 0x3a3   : > { %927 = vst [vmem:[#allocation1 + $0x22] ss:$4 sm:$0xff] %v905_v2  ;;  %v928_v6 = vld.sshfl [vmem:[#allocation1] sm:$0xff pattern:$0x73625140]  ;;  %v946_v10 = vrot.slane %v945_v3, 4 }
 0x3a4   : > { %v936_v9 = vadd.f32 %v928_v6, %v1571_v18 }
 0x3a5   : > { %v947_v16 = vmax.f32 %v945_v3, %v946_v10 }
 0x3a6   : > { %v940_v15 = vmax.f32 %v936_v9, 0.0 }
 0x3a7   : > { %v948_v22 = vrot.slane %v947_v16, 2 }
 0x3a8   : > { %v952_v20 = vsel %vm226_vm0, %v940_v15, -inf }
 0x3a9   : > { %v949_v24 = vmax.f32 %v947_v16, %v948_v22 }
 0x3aa   : > { %v929_v12 = vld.sshfl [vmem:[#allocation1 + $0x20] sm:$0xff pattern:$0x73625140] }
 0x3ab   : > { %v937_v13 = vadd.f32 %v929_v12, %v1577_v29  ;;  %v950_v18 = vrot.slane %v949_v24, 1 }
 0x3ad   : > { %v941_v19 = vmax.f32 %v937_v13, 0.0  ;;  %v951_v27 = vmax.f32 %v949_v24, %v950_v18 }
 0x3af   : > { %v953_v21 = vsel %vm943_vm8, %v941_v19, -inf }
 0x3b0   : > { %v954_v28 = vmax.f32 %v952_v20, %v953_v21 }
 0x3b2   : > { %v955_v23 = vrot.slane %v954_v28, 4 }
 0x3b4   : > { %v956_v37 = vmax.f32 %v954_v28, %v955_v23 }
 0x3b6   : > { %v957_v25 = vrot.slane %v956_v37, 2 }
 0x3b8   : > { %v958_v17 = vmax.f32 %v956_v37, %v957_v25 }
 0x3ba   : > { %v959_v26 = vrot.slane %v958_v17, 1 }
 0x3bc   : > { %v960_v29 = vmax.f32 %v958_v17, %v959_v26 }
 0x3be   : > { %v970_v4 = vsel %vm969_vm9, %v960_v29, %v951_v27 }
 0x3bf   : > { %1108 = vmatmul.msk.f32.vlgmr.msrb.gmra.mxu1 %vm226_vm0, %v970_v4 }
 0x43c   : > { %v990_v30 = vpop.f32.mrf.mxu1 }
 0x43d   : > { %v991_v34 = vadd.f32 %v1163_v44, %v990_v30 }
 0x43f   : > { %v994_v31 = vrot.slane %v991_v34, 1  ;;  %996 = vst [vmem:[%s166_s8] sm:$0x1] %v991_v34 }
 0x441   : > { %997 = vst [vmem:[%s166_s8 + $0x1] sm:$0x1] %v994_v31 }
 0x442   : > { %1191 = shalt.err (!%p1188_p3)
}
 0x443   : > { %s1228_s27 = smov 16   ;;  %s1229_s29 = smov 1  }
 0x444   : > { %1122 = dma.vmem_to_hbm [thread:$0]  (%p1285_p5), %s1011_s9, 32, %s1013_s11, %s999_s16, %s1228_s27, %s1228_s27, %s1229_s29  }
 0x445 PF: > { %p1128_p4 = scmp.ge.s32.totalorder %s1226_s15, 2  ;;  %s1027_s30 = sand.u32 1, %s1214_s12  }
 0x446   : > { %s1028_s10 = scalar_lea.sflag [#allocation3], %s1027_s30 }
 0x447   : > { %p1125_p7 = pnand %p1128_p4, %p1289_p6 }
 0x449   : > { %p1126_p8 = pneg %p1125_p7 }
 0x44b   : > { %1209 = dma.done.wait (%p1126_p8), %s1028_s10, 32  }
 0x44c   : > { %1211 = vsyncadd (%p1126_p8), %s1028_s10, 4294967264  ;;  %p13_p9 = scmp.ge.s32.totalorder %s1273_s18, 4   ;;  %s1652_s12 = smov %s1218_s13 }
 0x44d   : > { %s1653_s13 = smov %s1222_s14  ;;  %s1654_s14 = smov %s1283_s21 }
 0x44e   : > { %s1655_s15 = smov %s1273_s18  ;;  %15 = sbr.rel (!%p13_p9) target bundleno = 3 (0x3), region = 153 }
 0x453   :  { %1034 = vsyncpa [#allocation3], 1 }
 0x454   :  { %1036 = vsyncpa [#allocation3 + $0x1], 1 }

</bundles_post_ra>
